<compile_context>
chip_gen: v5e
topology: v5e:2x2
jax: 0.10.0
libtpu: 0.0.40
codegen_flags: <defaults>
</compile_context>

<pallas_src>
import jax
import jax.numpy as jnp
from jax.experimental import pallas as pl
from jax.experimental.pallas import tpu as pltpu


def _make_kernel(HW, T, needs_mask):
    inv_hw = 1.0 / float(HW)

    def kernel(x_ref, w1t_ref, w2t_ref, o_ref, max_acc, sum_acc):
        # x_ref  : (1, C, T)  one batch element, one spatial tile (C sublanes, T lanes)
        # w1t_ref: (C, Cr)    first 1x1 conv weight, transposed (in x out)
        # w2t_ref: (Cr, C)    second 1x1 conv weight, transposed
        # o_ref  : (1, 1, C)  sigmoid(se(max) + se(avg)), lane-dense store
        # max_acc: (C, 1) f32 running max across spatial tiles
        # sum_acc: (C, 1) f32 running sum across spatial tiles
        k = pl.program_id(1)
        nk = pl.num_programs(1)
        tile = x_ref[0]                                      # (C, T), native dtype

        def partials(t_max, t_sum):
            # Lane-axis (XLU) reductions; only the (C, 1) partials are f32.
            pm = jnp.max(t_max, axis=-1, keepdims=True).astype(jnp.float32)
            ps = jnp.sum(t_sum, axis=-1, keepdims=True, dtype=jnp.float32)
            return pm, ps

        def accumulate(pm, ps):
            @pl.when(k == 0)
            def _init():
                max_acc[...] = pm
                sum_acc[...] = ps

            @pl.when(k > 0)
            def _acc():
                max_acc[...] = jnp.maximum(max_acc[...], pm)
                sum_acc[...] = sum_acc[...] + ps

        def finalize():
            C = o_ref.shape[-1]
            # Two tiny relayouts, once per batch element (epilogue only).
            max_p = jnp.transpose(max_acc[...])                         # (1, C)
            avg_p = jnp.transpose(sum_acc[...]) * jnp.float32(inv_hw)   # (1, C)

            w1t = w1t_ref[...].astype(jnp.float32)            # (C, Cr)
            w2t = w2t_ref[...].astype(jnp.float32)            # (Cr, C)

            h = (jnp.maximum(
                    jnp.dot(max_p, w1t, preferred_element_type=jnp.float32), 0.0)
                 + jnp.maximum(
                    jnp.dot(avg_p, w1t, preferred_element_type=jnp.float32), 0.0))
            # Second conv is linear: se(max) + se(avg) = (h_max + h_avg) @ w2t.
            y = jnp.dot(h, w2t, preferred_element_type=jnp.float32)     # (1, C)
            o_ref[...] = jax.nn.sigmoid(y).reshape(1, 1, C).astype(o_ref.dtype)

        if needs_mask:
            # Interior tiles: fully valid -> no mask work at all on the hot path.
            @pl.when(k < nk - 1)
            def _interior():
                pm, ps = partials(tile, tile)
                accumulate(pm, ps)

            # Last tile: ragged; mask lanes >= HW - k*T.
            @pl.when(k == nk - 1)
            def _last():
                lane = jax.lax.broadcasted_iota(jnp.int32, tile.shape, 1)
                valid = lane < (HW - k * T)
                t_max = jnp.where(valid, tile, jnp.asarray(-jnp.inf, tile.dtype))
                t_sum = jnp.where(valid, tile, jnp.asarray(0, tile.dtype))
                pm, ps = partials(t_max, t_sum)
                accumulate(pm, ps)
                finalize()
        else:
            pm, ps = partials(tile, tile)
            accumulate(pm, ps)

            @pl.when(k == nk - 1)
            def _last():
                finalize()

    return kernel


def _generation_budget():
    """(per-block byte target, vmem_limit_bytes), chosen per TPU generation."""
    vmem_cap = 128 * 1024 * 1024
    try:
        vmem_cap = int(pltpu.get_tpu_info().vmem_capacity_bytes)
    except Exception:
        pass  # unknown chip / interpret mode -> conservative default
    if vmem_cap <= 80 * 1024 * 1024:
        # v7x: 64 MiB VMEM, ~3.2 TB/s HBM -> bigger blocks to amortize the
        # ~0.35 us per-grid-step overhead.  2 x 16 MiB double-buffer + weights
        # + scratch stays well under the 48 MiB limit.
        return 16 * 1024 * 1024, 48 * 1024 * 1024
    # v5e / v6e (128 MiB VMEM): 8 MiB blocks sit within a few % of roofline.
    return 8 * 1024 * 1024, 48 * 1024 * 1024


def _pick_spatial_tile(HW, C, itemsize, target_bytes):
    """Pick a lane-axis tile size T (multiple of 128 where possible) so the
    double-buffered (C, T) input block stays around `target_bytes`."""
    hw_pad = ((HW + 127) // 128) * 128
    t_cap = max(128, (target_bytes // max(1, C * itemsize)) // 128 * 128)
    t_cap = min(t_cap, hw_pad)                 # never exceed the padded extent
    if HW % 128 == 0:
        return min(HW, t_cap)
    if C * HW * itemsize <= target_bytes:
        return HW            # full extent: always a legal block shape, no masking
    return t_cap             # ragged last block; masked in-kernel (last tile only)


def channel_attention(x_nchw, w1, w2):
    """x_nchw: (B, C, H, W); w1: (Cr, C) conv1 weight; w2: (C, Cr) conv2 weight
    (PyTorch 1x1-conv weights with the trailing 1x1 dims squeezed).

    Returns (B, C, 1, 1) attention map matching the PyTorch module output.
    """
    B, C, H, W = x_nchw.shape
    Cr = w1.shape[0]
    HW = H * W

    # Free reshape: keeps the NCHW memory layout, no HBM transpose of x.
    x = x_nchw.reshape(B, C, HW)
    # Tiny weight transposes in the wrapper so the in-kernel epilogue is
    # lane-dense (row-vector GEMVs, lane-dense output store).
    w1t = w1.T                                  # (C, Cr)
    w2t = w2.T                                  # (Cr, C)

    itemsize = jnp.dtype(x.dtype).itemsize
    target_bytes, vmem_limit = _generation_budget()
    T = _pick_spatial_tile(HW, C, itemsize, target_bytes)
    n_k = pl.cdiv(HW, T)
    needs_mask = (n_k * T != HW)

    kernel = _make_kernel(HW, T, needs_mask)

    out = pl.pallas_call(
        kernel,
        out_shape=jax.ShapeDtypeStruct((B, 1, C), x.dtype),
        grid_spec=pltpu.PrefetchScalarGridSpec(
            num_scalar_prefetch=0,
            grid=(B, n_k),
            in_specs=[
                pl.BlockSpec((1, C, T), lambda b, k: (b, 0, k)),
                pl.BlockSpec((C, Cr), lambda b, k: (0, 0)),
                pl.BlockSpec((Cr, C), lambda b, k: (0, 0)),
            ],
            out_specs=pl.BlockSpec((1, 1, C), lambda b, k: (b, 0, 0)),
            scratch_shapes=[
                pltpu.VMEM((C, 1), jnp.float32),   # running max
                pltpu.VMEM((C, 1), jnp.float32),   # running sum (f32)
            ],
        ),
        compiler_params=pltpu.CompilerParams(
            # k carries the running max/sum -> must stay "arbitrary".
            dimension_semantics=("parallel", "arbitrary"),
            vmem_limit_bytes=vmem_limit,
        ),
    )(x, w1t, w2t)

    return out.reshape(B, C, 1, 1)


def _reference(x_nchw, w1, w2):
    # Plain-JAX reference mirroring the PyTorch forward.
    xf = x_nchw.astype(jnp.float32)
    max_p = jnp.max(xf, axis=(2, 3))          # (B, C)
    avg_p = jnp.mean(xf, axis=(2, 3))         # (B, C)

    def se(p):
        h = jnp.maximum(p @ w1.T.astype(jnp.float32), 0.0)   # (B, Cr)
        return h @ w2.T.astype(jnp.float32)                  # (B, C)

    out = jax.nn.sigmoid(se(max_p) + se(avg_p))
    return out.reshape(*out.shape, 1, 1).astype(x_nchw.dtype)


if __name__ == "__main__":
    # Small shapes consistent with the module. channel=32, reduction=4
    # (the default channel=3, reduction=16 gives a degenerate 0-channel
    #  hidden layer in PyTorch, so use a valid configuration).
    B, C, H, W = 2, 32, 16, 16
    reduction = 4
    Cr = C // reduction

    key = jax.random.PRNGKey(0)
    kx, k1, k2 = jax.random.split(key, 3)

    x = jax.random.normal(kx, (B, C, H, W), dtype=jnp.float32)
    # Conv2d(C, Cr, 1, bias=False) weight (Cr, C, 1, 1) -> (Cr, C)
    w1 = jax.random.normal(k1, (Cr, C), dtype=jnp.float32) * 0.1
    # Conv2d(Cr, C, 1, bias=False) weight (C, Cr, 1, 1) -> (C, Cr)
    w2 = jax.random.normal(k2, (C, Cr), dtype=jnp.float32) * 0.1

    out = jax.block_until_ready(channel_attention(x, w1, w2))
    ref = jax.block_until_ready(_reference(x, w1, w2))

    assert out.shape == (B, C, 1, 1), out.shape
    assert jnp.allclose(out, ref, atol=1e-5, rtol=1e-5), (
        f"max abs err = {jnp.max(jnp.abs(out - ref))}")
    print("KERNEL_OK")
</pallas_src>

<mosaic_0001>
module attributes {stable_mosaic.version = 11 : i64} {
  func.func @kernel(%arg0: i32, %arg1: i32, %arg2: memref<1x32x256xf32, #tpu.memory_space<vmem>>, %arg3: memref<32x8xf32, #tpu.memory_space<vmem>>, %arg4: memref<8x32xf32, #tpu.memory_space<vmem>>, %arg5: memref<1x1x32xf32, #tpu.memory_space<vmem>>, %arg6: memref<32x1xf32, #tpu.memory_space<vmem>>, %arg7: memref<32x1xf32, #tpu.memory_space<vmem>>) attributes {dimension_semantics = [#tpu.dimension_semantics<parallel>, #tpu.dimension_semantics<arbitrary>], iteration_bounds = array<i64: 2, 1>, scalar_prefetch = 0 : i64, scratch_operands = 2 : i64, tpu.core_type = #tpu.core_type<tc>, window_params = [{transform_indices = @transform_0, window_bounds = array<i64: 1, 32, 256>}, {pipeline_mode = #tpu.pipeline_mode<synchronous>, transform_indices = @transform_1, window_bounds = array<i64: 32, 8>}, {pipeline_mode = #tpu.pipeline_mode<synchronous>, transform_indices = @transform_2, window_bounds = array<i64: 8, 32>}, {transform_indices = @transform_3, window_bounds = array<i64: 1, 1, 32>}]} {
    %c0 = arith.constant 0 : index
    %c0_0 = arith.constant 0 : index
    %c0_1 = arith.constant 0 : index
    %0 = vector.load %arg2[%c0, %c0_0, %c0_1] : memref<1x32x256xf32, #tpu.memory_space<vmem>>, vector<1x32x256xf32>
    %1 = vector.shape_cast %0 : vector<1x32x256xf32> to vector<32x256xf32>
    %cst = arith.constant dense<0xFF800000> : vector<32xf32>
    %2 = vector.multi_reduction <maximumf>, %1, %cst [1] : vector<32x256xf32> to vector<32xf32>
    %3 = vector.shape_cast %2 : vector<32xf32> to vector<32x1xf32>
    %cst_2 = arith.constant dense<0.000000e+00> : vector<32xf32>
    %4 = vector.multi_reduction <add>, %1, %cst_2 [1] : vector<32x256xf32> to vector<32xf32>
    %5 = vector.shape_cast %4 : vector<32xf32> to vector<32x1xf32>
    %c0_i32 = arith.constant 0 : i32
    %6 = arith.cmpi eq, %arg1, %c0_i32 : i32
    %7 = arith.extui %6 : i1 to i32
    %c0_i32_3 = arith.constant 0 : i32
    %8 = arith.cmpi ne, %7, %c0_i32_3 : i32
    scf.if %8 {
      %c0_8 = arith.constant 0 : index
      %c0_9 = arith.constant 0 : index
      %15 = vector.load %arg6[%c0_8, %c0_9] : memref<32x1xf32, #tpu.memory_space<vmem>>, vector<32x1xf32>
      tpu.vector_store %arg6[%c0_8, %c0_9], %3 {strides = array<i32>} : memref<32x1xf32, #tpu.memory_space<vmem>>, vector<32x1xf32>,
      %c0_10 = arith.constant 0 : index
      %c0_11 = arith.constant 0 : index
      %16 = vector.load %arg7[%c0_10, %c0_11] : memref<32x1xf32, #tpu.memory_space<vmem>>, vector<32x1xf32>
      tpu.vector_store %arg7[%c0_10, %c0_11], %5 {strides = array<i32>} : memref<32x1xf32, #tpu.memory_space<vmem>>, vector<32x1xf32>,
    } else {
    }
    %c0_i32_4 = arith.constant 0 : i32
    %9 = arith.cmpi sgt, %arg1, %c0_i32_4 : i32
    %10 = arith.extui %9 : i1 to i32
    %c0_i32_5 = arith.constant 0 : i32
    %11 = arith.cmpi ne, %10, %c0_i32_5 : i32
    scf.if %11 {
      %c0_8 = arith.constant 0 : index
      %c0_9 = arith.constant 0 : index
      %15 = vector.load %arg6[%c0_8, %c0_9] : memref<32x1xf32, #tpu.memory_space<vmem>>, vector<32x1xf32>
      %16 = arith.maximumf %15, %3 : vector<32x1xf32>
      %c0_10 = arith.constant 0 : index
      %c0_11 = arith.constant 0 : index
      %17 = vector.load %arg6[%c0_10, %c0_11] : memref<32x1xf32, #tpu.memory_space<vmem>>, vector<32x1xf32>
      tpu.vector_store %arg6[%c0_10, %c0_11], %16 {strides = array<i32>} : memref<32x1xf32, #tpu.memory_space<vmem>>, vector<32x1xf32>,
      %c0_12 = arith.constant 0 : index
      %c0_13 = arith.constant 0 : index
      %18 = vector.load %arg7[%c0_12, %c0_13] : memref<32x1xf32, #tpu.memory_space<vmem>>, vector<32x1xf32>
      %19 = arith.addf %18, %5 : vector<32x1xf32>
      %c0_14 = arith.constant 0 : index
      %c0_15 = arith.constant 0 : index
      %20 = vector.load %arg7[%c0_14, %c0_15] : memref<32x1xf32, #tpu.memory_space<vmem>>, vector<32x1xf32>
      tpu.vector_store %arg7[%c0_14, %c0_15], %19 {strides = array<i32>} : memref<32x1xf32, #tpu.memory_space<vmem>>, vector<32x1xf32>,
    } else {
    }
    %c0_i32_6 = arith.constant 0 : i32
    %12 = arith.cmpi eq, %arg1, %c0_i32_6 : i32
    %13 = arith.extui %12 : i1 to i32
    %c0_i32_7 = arith.constant 0 : i32
    %14 = arith.cmpi ne, %13, %c0_i32_7 : i32
    scf.if %14 {
      %c0_8 = arith.constant 0 : index
      %c0_9 = arith.constant 0 : index
      %15 = vector.load %arg6[%c0_8, %c0_9] : memref<32x1xf32, #tpu.memory_space<vmem>>, vector<32x1xf32>
      %16 = tpu.transpose %15, [1, 0] : vector<32x1xf32> -> vector<1x32xf32>
      %c0_10 = arith.constant 0 : index
      %c0_11 = arith.constant 0 : index
      %17 = vector.load %arg7[%c0_10, %c0_11] : memref<32x1xf32, #tpu.memory_space<vmem>>, vector<32x1xf32>
      %18 = tpu.transpose %17, [1, 0] : vector<32x1xf32> -> vector<1x32xf32>
      %cst_12 = arith.constant 3.906250e-03 : f32
      %19 = vector.broadcast %cst_12 : f32 to vector<1x32xf32>
      %20 = arith.mulf %18, %19 : vector<1x32xf32>
      %c0_13 = arith.constant 0 : index
      %c0_14 = arith.constant 0 : index
      %21 = vector.load %arg3[%c0_13, %c0_14] : memref<32x8xf32, #tpu.memory_space<vmem>>, vector<32x8xf32>
      %c0_15 = arith.constant 0 : index
      %c0_16 = arith.constant 0 : index
      %22 = vector.load %arg4[%c0_15, %c0_16] : memref<8x32xf32, #tpu.memory_space<vmem>>, vector<8x32xf32>
      %cst_17 = arith.constant dense<0.000000e+00> : vector<1x8xf32>
      %23 = tpu.matmul %16, %21, %cst_17 {dimension_numbers = #tpu.dot_dimension_numbers<[1], [0], [0], [1], [0, 0, 1, 1], [], []>} : vector<1x32xf32>, vector<32x8xf32>, vector<1x8xf32> -> vector<1x8xf32>
      %cst_18 = arith.constant 0.000000e+00 : f32
      %24 = vector.broadcast %cst_18 : f32 to vector<1x8xf32>
      %25 = arith.maximumf %23, %24 : vector<1x8xf32>
      %cst_19 = arith.constant dense<0.000000e+00> : vector<1x8xf32>
      %26 = tpu.matmul %20, %21, %cst_19 {dimension_numbers = #tpu.dot_dimension_numbers<[1], [0], [0], [1], [0, 0, 1, 1], [], []>} : vector<1x32xf32>, vector<32x8xf32>, vector<1x8xf32> -> vector<1x8xf32>
      %cst_20 = arith.constant 0.000000e+00 : f32
      %27 = vector.broadcast %cst_20 : f32 to vector<1x8xf32>
      %28 = arith.maximumf %26, %27 : vector<1x8xf32>
      %29 = arith.addf %25, %28 : vector<1x8xf32>
      %cst_21 = arith.constant dense<0.000000e+00> : vector<1x32xf32>
      %30 = tpu.matmul %29, %22, %cst_21 {dimension_numbers = #tpu.dot_dimension_numbers<[1], [0], [0], [1], [0, 0, 1, 1], [], []>} : vector<1x8xf32>, vector<8x32xf32>, vector<1x32xf32> -> vector<1x32xf32>
      %31 = arith.negf %30 : vector<1x32xf32>
      %32 = math.exp %31 : vector<1x32xf32>
      %cst_22 = arith.constant 1.000000e+00 : f32
      %33 = vector.broadcast %cst_22 : f32 to vector<1x32xf32>
      %34 = arith.addf %33, %32 : vector<1x32xf32>
      %35 = arith.divf %33, %34 : vector<1x32xf32>
      %36 = vector.shape_cast %35 : vector<1x32xf32> to vector<1x1x32xf32>
      %c0_23 = arith.constant 0 : index
      %c0_24 = arith.constant 0 : index
      %c0_25 = arith.constant 0 : index
      %37 = vector.load %arg5[%c0_23, %c0_24, %c0_25] : memref<1x1x32xf32, #tpu.memory_space<vmem>>, vector<1x1x32xf32>
      tpu.vector_store %arg5[%c0_23, %c0_24, %c0_25], %36 {strides = array<i32>} : memref<1x1x32xf32, #tpu.memory_space<vmem>>, vector<1x1x32xf32>,
    } else {
    }
    return
  }
  func.func @transform_0(%arg0: i32, %arg1: i32) -> (i32, i32, i32) {
    %c0_i32 = arith.constant 0 : i32
    %c0_i32_0 = arith.constant 0 : i32
    return %arg0, %c0_i32, %arg1 : i32, i32, i32
  }
  func.func @transform_1(%arg0: i32, %arg1: i32) -> (i32, i32) {
    %c0_i32 = arith.constant 0 : i32
    %c0_i32_0 = arith.constant 0 : i32
    %c0_i32_1 = arith.constant 0 : i32
    return %c0_i32, %c0_i32_0 : i32, i32
  }
  func.func @transform_2(%arg0: i32, %arg1: i32) -> (i32, i32) {
    %c0_i32 = arith.constant 0 : i32
    %c0_i32_0 = arith.constant 0 : i32
    %c0_i32_1 = arith.constant 0 : i32
    return %c0_i32, %c0_i32_0 : i32, i32
  }
  func.func @transform_3(%arg0: i32, %arg1: i32) -> (i32, i32, i32) {
    %c0_i32 = arith.constant 0 : i32
    %c0_i32_0 = arith.constant 0 : i32
    %c0_i32_1 = arith.constant 0 : i32
    return %arg0, %c0_i32, %c0_i32_0 : i32, i32, i32
  }
}

</mosaic_0001>

<bundles_post_ra>
// kernel: tpu_custom_call.1
= control target key start
LH: loop header
LB: loop body
LE: loop exit
PB: predicated region body
PF: predicated region fallthrough
CT: control target
= control target key end

     0   :  { %8 = vsyncpa [#allocation5], 0  ;;  %s912_s0 = inlined_call_operand.hbm [shape: f32[2,32,256], index: 0, kind: input, shape index: {}]   ;;  %s913_s1 = inlined_call_operand.vmem [shape: f32[32,8], index: 1, kind: input, shape index: {}]   ;;  %s914_s2 = inlined_call_operand.vmem [shape: f32[8,32], index: 2, kind: input, shape index: {}]   ;;  %s915_s3 = inlined_call_operand.hbm [shape: f32[2,1,32], index: 3, kind: output, shape index: {}]  }
   0x1   :  { %10 = vsyncpa [#allocation5 + $0x1], 0 }
   0x2   :  { %11 = vsyncpa [#allocation6], 0 }
   0x3   :  { %13 = vsyncpa [#allocation6 + $0x1], 0  ;;  %s768_s12 = smov 0   ;;  %s770_s13 = smov 0  }
   0x4   :  { %s772_s14 = smov 0   ;;  %s774_s15 = smov 0  }
   0x5   :  { %s776_s16 = smov 0   ;;  %s778_s17 = smov 0  }
   0x6 LB: > { %s547_s18 = sadd.s32 4294967295, %s744_s17   ;;  %s548_s19 = sadd.s32 4294967294, %s744_s17   ;;  %s744_s17 = sphi %s778_s17, %s19_s17   ;;  %s740_s16 = sphi %s776_s16, %s924_s16   ;;  %s736_s15 = sphi %s774_s15, %s923_s15   ;;  %s732_s14 = sphi %s772_s14, %s922_s14   ;;  %s728_s13 = sphi %s770_s13, %s921_s13   ;;  %s724_s12 = sphi %s768_s12, %s920_s12  }
   0x7   : > { %s31_s20 = sadd.s32 1, %s740_s16  ;;  %s40_s21 = sadd.s32 1, %s732_s14 }
   0x8   : > { %p33_p0 = scmp.ge.s32.totalorder %s31_s20, 2  ;;  %p47_p1 = scmp.ne.s32.totalorder %s732_s14, %s728_s13 }
   0x9   : > { %p48_p2 = scmp.eq.s32.totalorder %s744_s17, 0  ;;  %p53_p3 = scmp.ne.s32.totalorder %s728_s13, %s724_s12 }
   0xa   : > { %s926_s20 = smov (%p33_p0, %s31_s20), 0  ;;  %p54_p5 = scmp.eq.s32.totalorder %s547_s18, 0 }
   0xb   : > { %p809_p4 = por %p48_p2, %p47_p1  ;;  %s35_s23 = ssub.s32 %s740_s16, %s926_s20 }
   0xc   : > { %p119_p6 = scmp.eq.s32.totalorder %s547_s18, 1  ;;  %p38_p7 = scmp.eq.s32.totalorder %s35_s23, 0 }
   0xd   : > { %p815_p8 = por %p54_p5, %p53_p3  ;;  %p125_p10 = scmp.eq.s32.totalorder %s548_s19, 1 }
   0xe   : > { %p819_p9 = por %p119_p6, %p47_p1  ;;  %p550_p12 = scmp.ge.s32.totalorder %s744_s17, 2 }
   0xf   : > { %s824_s26 = scalar_select %p38_p7, %s732_s14, %s40_s21  }
  0x10   : > { %p826_p11 = por %p125_p10, %p53_p3  ;;  %p575_p13 = scmp.lt.s32.totalorder %s744_s17, 2 }
  0x11   : > { %s151_s28 = sand.u32 1, %s732_s14   ;;  %s562_s30 = sshll.u32 %s740_s16, 6 }
  0x12   : > { %s551_s29 = sshll.u32 %s151_s28, 6  ;;  %s162_s6 = scalar_lea.hbm %s912_s0, %s562_s30 }
  0x13   : > { %s155_s7 = scalar_lea.vmem [#allocation4], %s551_s29  ;;  %s163_s9 = sshll.u32 %s162_s6, 4  ;;  %s164_s9 = int_to_ptr.hbm [resolvable:$true] %s163_s9 }
  0x14   : > { %s165_s8 = sshll.u32 %s155_s7, 4  ;;  %p568_p0 = pnand %p575_p13, %p809_p4  ;;  %s166_s8 = int_to_ptr.vmem [resolvable:$true] %s165_s8 }
  0x15   : > { %p554_p1 = scmp.ge.s32.totalorder %s744_s17, 1  ;;  %s152_s10 = scalar_lea.sflag [#allocation5], %s151_s28 }
  0x16   : > { %s746_s11 = smov 256   ;;  %s747_s18 = smov 16  }
  0x17   : > { %570 = dma.hbm_to_vmem [thread:$0]  (!%p568_p0), %s164_s9, 1024, %s166_s8, %s152_s10, %s746_s11, %s746_s11, %s747_s18  }
  0x18   : > { %p173_p2 = scmp.lt.s32.totalorder %s744_s17, 3 }
  0x1a   : > { %p174_p3 = pnand %p554_p1, %p173_p2 }
  0x1b   : > { %s842_s19 = sand.u32 (!%p174_p3), 1, %s728_s13  }
  0x1c   : > { %177 = sbr.rel (%p174_p3) target bundleno = 627 (0x273), region = 32  ;;  %s555_s21 = sshll.u32 (!%p174_p3), %s842_s19, 6 }
  0x1d   : > { %s180_s23 = scalar_lea.sflag (!%p174_p3), [#allocation5], %s842_s19  ;;  %s183_s29 = scalar_lea.vmem (!%p174_p3), [#allocation4], %s555_s21 }
  0x21   : > { %715 = dma.done.wait (%p815_p8), %s180_s23, 1024  }
  0x22   : > { %717 = vsyncadd (%p815_p8), %s180_s23, 4294966272  ;;  %v207_v0 = vld [vmem:[%s183_s29] sm:$0xff]  ;;  %v208_v1 = vld [vmem:[%s183_s29 + $0x8] sm:$0xff]  ;;  %vm243_vm0 = vcmask 7168   ;;  %vm362_vm1 = vcmask 261120   ;;  %vm412_vm2 = vcmask 64512   ;;  %s466_s18 = scalar_lea.hbm %s915_s3, %s736_s15 }
  0x23   : > { %v209_v2 = vld [vmem:[%s183_s29 + $0x10] sm:$0xff]  ;;  %v227_v3 = vadd.f32 %v208_v1, %v207_v0  ;;  %v210_v4 = vld [vmem:[%s183_s29 + $0x18] sm:$0xff]  ;;  %v211_v5 = vld [vmem:[%s183_s29 + $0x20] sm:$0xff]  ;;  %v215_v9 = vmax.f32 %v207_v0, %v208_v1  ;;  %s205_s21 = scalar_lea.vmem [#allocation7], %s842_s19  ;;  %vm455_vm6 = vcmask 253952   ;;  %s458_s15 = scalar_lea.sflag [#allocation6], %s842_s19 }
  0x24   : > { %v212_v6 = vld [vmem:[%s183_s29 + $0x28] sm:$0xff]  ;;  %v230_v7 = vadd.f32 %v210_v4, %v209_v2  ;;  %v218_v10 = vmax.f32 %v209_v2, %v210_v4  ;;  %v213_v12 = vld [vmem:[%s183_s29 + $0x30] sm:$0xff]  ;;  %v214_v13 = vld [vmem:[%s183_s29 + $0x38] sm:$0xff]  ;;  %s468_s23 = sshll.u32 %s205_s21, 4  ;;  %s470_s29 = sshll.u32 %s466_s18, 4  ;;  %s469_s23 = int_to_ptr.vmem [resolvable:$true] %s468_s23  ;;  %s471_s29 = int_to_ptr.hbm [resolvable:$true] %s470_s29 }
  0x25   : > { %v233_v8 = vadd.f32 %v212_v6, %v211_v5  ;;  %228 = vadd.xlane.f32.xlu0 %v227_v3  ;;  %v221_v11 = vmax.f32 %v211_v5, %v212_v6  ;;  %v236_v14 = vadd.f32 %v214_v13, %v213_v12  ;;  %v224_v15 = vmax.f32 %v213_v12, %v214_v13  ;;  %v360_v23 = vld [vmem:[%s913_s1 + $0x18] sm:$0xff]  ;;  %v359_v24 = vld [vmem:[%s913_s1 + $0x10] sm:$0xff]  ;;  %v358_v25 = vld [vmem:[%s913_s1 + $0x8] sm:$0xff]  ;;  %s676_s22 = sshra.s32 %s471_s29, 4  ;;  %s682_s4 = scalar_lea.hbm %s915_s3, 2  ;;  %s677_s22 = int_to_ptr.hbm [resolvable:$true] %s676_s22 }
  0x26   : > { %231 = vadd.xlane.f32.xlu1 %v230_v7  ;;  %378 = vmatpush.msra.mxu0 %v360_v23  ;;  %v357_v35 = vld [vmem:[%s913_s1] sm:$0xff]  ;;  %s678_s24 = scalar_lea.hbm %s677_s22, 1  ;;  %p683_p7 = scmp.lt.s32.totalorder %s677_s22, %s915_s3 }
  0x27   : > { %234 = vadd.xlane.f32.xlu2 %v233_v8  ;;  %402 = vmatpush.msra.mxu1 %v360_v23  ;;  %v361_v39 = vld [vmem:[%s914_s2] sm:$0xff]  ;;  %p679_p4 = scmp.ne.s32.totalorder %s677_s22, %s678_s24  ;;  %p684_p8 = scmp.lt.s32.totalorder %s682_s4, %s678_s24 }
  0x28   : > { %379 = vmatpush.msra.mxu0 %v359_v24  ;;  %431 = vmatpush.msra.mxu2 %v361_v39 }
  0x29   : > { %403 = vmatpush.msra.mxu1 %v359_v24  ;;  %p680_p5 = pnand %p679_p4, %p819_p9  ;;  %p685_p10 = por %p684_p8, %p683_p7 }
  0x2a   : > { %380 = vmatpush.msra.mxu0 %v358_v25 }
  0x2b   : > { %404 = vmatpush.msra.mxu1 %v358_v25  ;;  %p681_p6 = pneg %p680_p5 }
  0x2c   : > { %381 = vmatpush.msra.mxu0 %v357_v35 }
  0x2d   : > { %216 = vmax.xlane.f32.xlu0 %v215_v9  ;;  %405 = vmatpush.msra.mxu1 %v357_v35  ;;  %p686_p13 = pnand %p685_p10, %p681_p6 }
  0x2e   : > { %219 = vmax.xlane.f32.xlu1 %v218_v10 }
  0x2f   : > { %222 = vmax.xlane.f32.xlu2 %v221_v11 }
  0x35   : > { %237 = vadd.xlane.f32.xlu0 %v236_v14 }
  0x36   : > { %225 = vmax.xlane.f32.xlu1 %v224_v15 }
  0x98   : > { %v229_v16 = vpop.xlane.xlu0 %228 }
  0x99   : > { %248 = vst.msk [vmem:[#allocation3] sm:$0xff] %vm243_vm0, %v229_v16  ;;  %v232_v17 = vpop.xlane.xlu1 %231 }
  0x9a   : > { %v235_v18 = vpop.xlane.xlu2 %234  ;;  %249 = vst.msk [vmem:[#allocation3 + $0x8] sm:$0xff] %vm243_vm0, %v232_v17 }
  0x9b   : > { %250 = vst.msk [vmem:[#allocation3 + $0x10] sm:$0xff] %vm243_vm0, %v235_v18 }
  0xa0   : > { %v217_v19 = vpop.xlane.xlu0 %216  ;;  %v320_v20 = vld [vmem:[#allocation3] sm:$0xff] }
  0xa1   : > { %244 = vst.msk [vmem:[#allocation2] sm:$0xff] %vm243_vm0, %v217_v19  ;;  %324 = vxpose.xlu2.b32.start [1/4] (short) (narrow) %v320_v20, 8  ;;  %v220_v21 = vpop.xlane.xlu1 %219  ;;  %v321_v26 = vld [vmem:[#allocation3 + $0x8] sm:$0xff] }
  0xa2   : > { %v223_v22 = vpop.xlane.xlu2 %222  ;;  %245 = vst.msk [vmem:[#allocation2 + $0x8] sm:$0xff] %vm243_vm0, %v220_v21  ;;  %v322_v30 = vld [vmem:[#allocation3 + $0x10] sm:$0xff] }
  0xa3   : > { %246 = vst.msk [vmem:[#allocation2 + $0x10] sm:$0xff] %vm243_vm0, %v223_v22 }
  0xa8   : > { %v284_v27 = vld [vmem:[#allocation2] sm:$0xff]  ;;  %v238_v28 = vpop.xlane.xlu0 %237 }
  0xa9   : > { %325 = vxpose.xlu2.b32.cont [2/4] (short) (narrow) %v321_v26, 8  ;;  %288 = vxpose.xlu0.b32.start [1/4] (short) (narrow) %v284_v27, 8  ;;  %v226_v29 = vpop.xlane.xlu1 %225  ;;  %251 = vst.msk [vmem:[#allocation3 + $0x18] sm:$0xff] %vm243_vm0, %v238_v28  ;;  %v285_v31 = vld [vmem:[#allocation2 + $0x8] sm:$0xff] }
  0xaa   : > { %247 = vst.msk [vmem:[#allocation2 + $0x18] sm:$0xff] %vm243_vm0, %v226_v29  ;;  %v286_v32 = vld [vmem:[#allocation2 + $0x10] sm:$0xff] }
  0xb0   : > { %v323_v33 = vld [vmem:[#allocation3 + $0x18] sm:$0xff] }
  0xb1   : > { %326 = vxpose.xlu2.b32.cont [3/4] (short) (narrow) %v322_v30, 8  ;;  %289 = vxpose.xlu0.b32.cont [2/4] (short) (narrow) %v285_v31, 8  ;;  %v287_v34 = vld [vmem:[#allocation2 + $0x18] sm:$0xff] }
  0xb9   : > { %290 = vxpose.xlu0.b32.cont [3/4] (short) (narrow) %v286_v32, 8  ;;  %327 = vxpose.xlu2.b32.end [4/4] (short) (narrow) %v323_v33, 8 }
  0xc1   : > { %291 = vxpose.xlu0.b32.end [4/4] (short) (narrow) %v287_v34, 8 }
 0x13a   : > { %v340_v36 = vpop.trf.xlu2 }
 0x13b   : > { %v356_v37 = vmul.f32 0.00390625, %v340_v36 }
 0x13d   : > { %557 = vmatmul.msk.f32.vlgmr.msra.gmra.mxu1 %vm362_vm1, %v356_v37 }
 0x14d   : > { %v304_v38 = vpop.trf.xlu0 }
 0x14e   : > { %556 = vmatmul.msk.f32.vlgmr.msra.gmra.mxu0 %vm362_vm1, %v304_v38 }
 0x1ba   : > { %v407_v40 = vpop.f32.mrf.mxu1 }
 0x1bb   : > { %v410_v41 = vmax.f32 %v407_v40, 0.0 }
 0x1cb   : > { %v383_v42 = vpop.f32.mrf.mxu0 }
 0x1cc   : > { %v386_v43 = vmax.f32 %v383_v42, 0.0 }
 0x1ce   : > { %v411_v44 = vadd.f32 %v410_v41, %v386_v43 }
 0x1d0   : > { %558 = vmatmul.msk.f32.vlgmr.msra.gmra.mxu2 %vm412_vm2, %v411_v44 }
 0x253   : > { %v433_v45 = vpop.f32.mrf.mxu2 }
 0x254   : > { %v559_v46 = vmul.f32 -1.442695, %v433_v45 }
 0x256   : > { %628 = vpow2.f32 %v559_v46 }
 0x25c   : > { %v629_v47 = vpop.eup %628 }
 0x25d   : > { %v439_v48 = vadd.f32 1.0, %v629_v47 }
 0x25f   : > { %630 = vrcp.f32 %v439_v48  ;;  %v451_v52 = vand.u32 2147483648, %v439_v48  ;;  %v449_v54 = vand.u32 2147483647, %v439_v48  ;;  %vm445_vm4 = vweird.f32 %v439_v48 }
 0x261   : > { %v452_v56 = vor.u32 1.1754944e-38, %v451_v52  ;;  %vm450_vm7 = vcmp.eq.f32.partialorder %v449_v54, 8.507059e+37 }
 0x265   : > { %v631_v49 = vpop.eup %630 }
 0x266   : > { %v441_v50 = vmul.f32 %v631_v49, %v439_v48  ;;  %vm446_vm3 = vweird.f32 %v631_v49 }
 0x267   : > { %vm447_vm5 = vmor %vm445_vm4, %vm446_vm3 }
 0x268   : > { %v442_v51 = vsub.f32 1.0, %v441_v50 }
 0x26a   : > { %v443_v53 = vmul.f32 %v631_v49, %v442_v51 }
 0x26c   : > { %v444_v55 = vadd.f32 %v631_v49, %v443_v53 }
 0x26e   : > { %v448_v57 = vsel %vm447_vm5, %v631_v49, %v444_v55 }
 0x26f   : > { %v453_v58 = vsel %vm450_vm7, %v452_v56, %v448_v57 }
 0x270   : > { %456 = vst.msk [vmem:[%s205_s21] sm:$0x1] %vm455_vm6, %v453_v58 }
 0x271   : > { %689 = shalt.err (!%p686_p13)
}
 0x272   : > { %565 = dma.vmem_to_hbm [thread:$0]  (%p819_p9), %s469_s23, 16, %s471_s29, %s458_s15  }
 0x273 PF: > { %s482_s19 = sand.u32 1, %s724_s12   ;;  %p572_p0 = pnand %p550_p12, %p826_p11 }
 0x274   : > { %s483_s7 = scalar_lea.sflag [#allocation6], %s482_s19 }
 0x275   : > { %p573_p1 = pneg %p572_p0 }
 0x277   : > { %719 = dma.done.wait (%p573_p1), %s483_s7, 16  }
 0x278   : > { %721 = vsyncadd (%p573_p1), %s483_s7, 4294967280  ;;  %s19_s17 = sadd.s32 1, %s744_s17   ;;  %s920_s12 = smov %s728_s13 }
 0x279   : > { %p16_p2 = scmp.ge.s32.totalorder %s19_s17, 4   ;;  %s921_s13 = smov %s732_s14 }
 0x27a   : > { %s922_s14 = smov %s824_s26  ;;  %s923_s15 = smov %s740_s16 }
 0x27b   : > { %s924_s16 = smov %s926_s20  ;;  %18 = sbr.rel (!%p16_p2) target bundleno = 6 (0x6), region = 89 }
 0x280   :  { %488 = vsyncpa [#allocation5], 1 }
 0x281   :  { %490 = vsyncpa [#allocation5 + $0x1], 1 }
 0x282   :  { %491 = vsyncpa [#allocation6], 1 }
 0x283   :  { %493 = vsyncpa [#allocation6 + $0x1], 1 }

</bundles_post_ra>
